<compile_context>
chip_gen: v5e
topology: v5e:2x2
jax: 0.10.0
libtpu: 0.0.40
codegen_flags: <defaults>
</compile_context>

<pallas_src>
import jax
import jax.numpy as jnp
from jax import lax
from jax.experimental import pallas as pl
from jax.experimental.pallas import tpu as pltpu


def _span_cls_head_kernel(x_ref, w1_ref, w2_ref, o_ref):
    # x_ref:  (tile_m, hidden)        activations (rows on sublanes, hidden on lanes)
    # w1_ref: (hidden, hidden)        head_1.weight (untransposed)
    # w2_ref: (n_class_pad, hidden)   head_2.weight, zero-padded to lane-dense N
    # o_ref:  (tile_m, n_class_pad)
    #
    # y = x @ W1^T  ==  contract x dim 1 with W1 dim 1.
    h = lax.dot_general(
        x_ref[...], w1_ref[...],
        dimension_numbers=(((1,), (1,)), ((), ())),
        preferred_element_type=jnp.float32,
    )
    # z = y @ W2^T  ==  contract h dim 1 with W2 dim 1.
    z = lax.dot_general(
        h.astype(x_ref.dtype), w2_ref[...],
        dimension_numbers=(((1,), (1,)), ((), ())),
        preferred_element_type=jnp.float32,
    )
    o_ref[...] = z.astype(o_ref.dtype)


def _round_up(v, mult):
    return ((v + mult - 1) // mult) * mult


def simple_span_cls_head(features, w1, w2, *, tile_m=None,
                         vmem_cap_bytes=40 * 1024 * 1024):
    """features: (..., hidden). w1: (hidden, hidden), w2: (n_class, hidden).

    Returns (..., n_class), matching head_2(head_1(features)) with bias-free
    nn.Linear semantics.  Works for f32 or bf16 inputs/weights.
    """
    hidden = features.shape[-1]
    n_class = w2.shape[0]
    lead_shape = features.shape[:-1]

    # Keep weights in the activation dtype so both MXU operands match.
    w1 = w1.astype(features.dtype)
    w2 = w2.astype(features.dtype)

    x2d = features.reshape(-1, hidden)
    m = x2d.shape[0]

    # Lane-dense output / second-matmul N dim: pad n_class up to a multiple of 128.
    n_pad = _round_up(n_class, 128)
    w2p = jnp.pad(w2, ((0, n_pad - n_class), (0, 0))) if n_pad != n_class else w2

    itemsize = jnp.dtype(features.dtype).itemsize

    def _budget(tm):
        wbytes = (hidden * hidden + n_pad * hidden) * itemsize   # single-buffered weights
        xbytes = 2 * tm * hidden * itemsize                      # double-buffered x tile
        obytes = 2 * tm * n_pad * itemsize                       # double-buffered out tile
        accbytes = tm * (hidden + n_pad) * 4                     # f32 intermediates
        return wbytes + xbytes + obytes + accbytes

    # Pick the largest row tile (<=512, multiple of 8) that fits the VMEM budget.
    m_rounded = max(8, _round_up(m, 8))
    if tile_m is None:
        tile_m = min(512, m_rounded)
        while tile_m > 8 and _budget(tile_m) > vmem_cap_bytes:
            tile_m = max(8, _round_up(tile_m // 2, 8))
    tile_m = max(8, _round_up(min(tile_m, m_rounded), 8))
    vmem_limit = int(min(_budget(tile_m) + (4 << 20), 100 << 20))

    grid_m = pl.cdiv(m, tile_m)

    out = pl.pallas_call(
        _span_cls_head_kernel,
        out_shape=jax.ShapeDtypeStruct((m, n_pad), features.dtype),
        grid_spec=pltpu.PrefetchScalarGridSpec(
            num_scalar_prefetch=0,
            grid=(grid_m,),
            in_specs=[
                pl.BlockSpec((tile_m, hidden), lambda i: (i, 0)),
                # Resident weights: constant index_map, single buffer.
                pl.BlockSpec((hidden, hidden), lambda i: (0, 0),
                             pipeline_mode=pl.Buffered(1)),
                pl.BlockSpec((n_pad, hidden), lambda i: (0, 0),
                             pipeline_mode=pl.Buffered(1)),
            ],
            out_specs=pl.BlockSpec((tile_m, n_pad), lambda i: (i, 0)),
        ),
        compiler_params=pltpu.CompilerParams(
            dimension_semantics=("parallel",),
            vmem_limit_bytes=vmem_limit,
        ),
    )(x2d, w1, w2p)

    out = out[:, :n_class]
    return out.reshape(*lead_shape, n_class)


def _xavier_uniform(key, shape):
    # nn.init.xavier_uniform_ for a Linear weight of shape (out, in):
    # bound = sqrt(6 / (fan_in + fan_out))
    fan_out, fan_in = shape
    bound = (6.0 / (fan_in + fan_out)) ** 0.5
    return jax.random.uniform(key, shape, jnp.float32, minval=-bound, maxval=bound)


if __name__ == "__main__":
    hidden_dim = 32
    n_class = 8
    batch, seq = 2, 8

    key = jax.random.PRNGKey(0)
    k_x, k_w1, k_w2 = jax.random.split(key, 3)

    features = jax.random.normal(k_x, (batch, seq, hidden_dim), jnp.float32)
    w1 = _xavier_uniform(k_w1, (hidden_dim, hidden_dim))   # head_1.weight
    w2 = _xavier_uniform(k_w2, (n_class, hidden_dim))      # head_2.weight

    out = simple_span_cls_head(features, w1, w2)
    out = jax.block_until_ready(out)

    # Reference check in plain JAX (same math as the PyTorch module).
    ref = (features @ w1.T) @ w2.T
    assert out.shape == (batch, seq, n_class), out.shape
    assert jnp.allclose(out, ref, atol=1e-5, rtol=1e-5), "mismatch vs reference"

    print("KERNEL_OK")
</pallas_src>

<mosaic_0001>
module attributes {stable_mosaic.version = 11 : i64} {
  func.func @_span_cls_head_kernel(%arg0: i32, %arg1: memref<16x32xf32, #tpu.memory_space<vmem>>, %arg2: memref<32x32xf32, #tpu.memory_space<vmem>>, %arg3: memref<128x32xf32, #tpu.memory_space<vmem>>, %arg4: memref<16x128xf32, #tpu.memory_space<vmem>>) attributes {dimension_semantics = [#tpu.dimension_semantics<parallel>], iteration_bounds = array<i64: 1>, scalar_prefetch = 0 : i64, scratch_operands = 0 : i64, tpu.core_type = #tpu.core_type<tc>, window_params = [{transform_indices = @transform_0, window_bounds = array<i64: 16, 32>}, {pipeline_mode = #tpu.pipeline_mode<synchronous>, transform_indices = @transform_1, window_bounds = array<i64: 32, 32>}, {pipeline_mode = #tpu.pipeline_mode<synchronous>, transform_indices = @transform_2, window_bounds = array<i64: 128, 32>}, {transform_indices = @transform_3, window_bounds = array<i64: 16, 128>}]} {
    %c0 = arith.constant 0 : index
    %c0_0 = arith.constant 0 : index
    %0 = vector.load %arg1[%c0, %c0_0] : memref<16x32xf32, #tpu.memory_space<vmem>>, vector<16x32xf32>
    %c0_1 = arith.constant 0 : index
    %c0_2 = arith.constant 0 : index
    %1 = vector.load %arg2[%c0_1, %c0_2] : memref<32x32xf32, #tpu.memory_space<vmem>>, vector<32x32xf32>
    %cst = arith.constant dense<0.000000e+00> : vector<16x32xf32>
    %2 = tpu.matmul %0, %1, %cst {dimension_numbers = #tpu.dot_dimension_numbers<[1], [1], [0], [0], [0, 0, 1, 0], [], []>} : vector<16x32xf32>, vector<32x32xf32>, vector<16x32xf32> -> vector<16x32xf32>
    %c0_3 = arith.constant 0 : index
    %c0_4 = arith.constant 0 : index
    %3 = vector.load %arg3[%c0_3, %c0_4] : memref<128x32xf32, #tpu.memory_space<vmem>>, vector<128x32xf32>
    %cst_5 = arith.constant dense<0.000000e+00> : vector<16x128xf32>
    %4 = tpu.matmul %2, %3, %cst_5 {dimension_numbers = #tpu.dot_dimension_numbers<[1], [1], [0], [0], [0, 0, 1, 0], [], []>} : vector<16x32xf32>, vector<128x32xf32>, vector<16x128xf32> -> vector<16x128xf32>
    %c0_6 = arith.constant 0 : index
    %c0_7 = arith.constant 0 : index
    %5 = vector.load %arg4[%c0_6, %c0_7] : memref<16x128xf32, #tpu.memory_space<vmem>>, vector<16x128xf32>
    tpu.vector_store %arg4[%c0_6, %c0_7], %4 {strides = array<i32>} : memref<16x128xf32, #tpu.memory_space<vmem>>, vector<16x128xf32>,
    return
  }
  func.func @transform_0(%arg0: i32) -> (i32, i32) {
    %c0_i32 = arith.constant 0 : i32
    %c0_i32_0 = arith.constant 0 : i32
    return %arg0, %c0_i32 : i32, i32
  }
  func.func @transform_1(%arg0: i32) -> (i32, i32) {
    %c0_i32 = arith.constant 0 : i32
    %c0_i32_0 = arith.constant 0 : i32
    %c0_i32_1 = arith.constant 0 : i32
    return %c0_i32, %c0_i32_0 : i32, i32
  }
  func.func @transform_2(%arg0: i32) -> (i32, i32) {
    %c0_i32 = arith.constant 0 : i32
    %c0_i32_0 = arith.constant 0 : i32
    %c0_i32_1 = arith.constant 0 : i32
    return %c0_i32, %c0_i32_0 : i32, i32
  }
  func.func @transform_3(%arg0: i32) -> (i32, i32) {
    %c0_i32 = arith.constant 0 : i32
    %c0_i32_0 = arith.constant 0 : i32
    return %arg0, %c0_i32 : i32, i32
  }
}

</mosaic_0001>

<bundles_post_ra>
// kernel: tpu_custom_call.1
= control target key start
LH: loop header
LB: loop body
LE: loop exit
PB: predicated region body
PF: predicated region fallthrough
CT: control target
= control target key end

     0   :  { %vm21_vm0 = vcmask 261120   ;;  %s377_s0 = inlined_call_operand.vmem [shape: f32[16,32], index: 0, kind: input, shape index: {}]   ;;  %s378_s1 = inlined_call_operand.vmem [shape: f32[32,32], index: 1, kind: input, shape index: {}]   ;;  %s379_s2 = inlined_call_operand.vmem [shape: f32[128,32], index: 2, kind: input, shape index: {}]   ;;  %s380_s3 = inlined_call_operand.hbm [shape: f32[16,128], index: 3, kind: output, shape index: {}]  }
   0x1   :  { %v20_v0 = vld [vmem:[%s378_s1 + $0x18] sm:$0xff]  ;;  %v19_v1 = vld [vmem:[%s378_s1 + $0x10] sm:$0xff] }
   0x2   :  { %176 = vmatpush.xpose.msk.msra.mxu0 %vm21_vm0, %v20_v0  ;;  %v78_v2 = vld [vmem:[%s379_s2 + $0x78] sm:$0xff]  ;;  %v77_v3 = vld [vmem:[%s379_s2 + $0x70] sm:$0xff] }
   0x3   :  { %182 = vmatpush.xpose.msk.msra.mxu1 %vm21_vm0, %v78_v2  ;;  %200 = vmatpush.xpose.msk.msra.mxu2 %vm21_vm0, %v78_v2 }
   0x6   :  { %177 = vmatpush.xpose.msk.msra.mxu0 %vm21_vm0, %v19_v1 }
   0x7   :  { %8 = vsyncpa [#allocation3], 0  ;;  %v18_v4 = vld [vmem:[%s378_s1 + $0x8] sm:$0xff]  ;;  %183 = vmatpush.xpose.msk.msra.mxu1 %vm21_vm0, %v77_v3  ;;  %201 = vmatpush.xpose.msk.msra.mxu2 %vm21_vm0, %v77_v3  ;;  %v17_v6 = vld [vmem:[%s378_s1] sm:$0xff]  ;;  %s245_s27 = smov [#allocation2]   ;;  %s164_s30 = sshll.u32 %s380_s3, 4  ;;  %s165_s30 = int_to_ptr.hbm [resolvable:$true] %s164_s30 }
   0x8   :  { %v76_v5 = vld [vmem:[%s379_s2 + $0x68] sm:$0xff]  ;;  %v75_v7 = vld [vmem:[%s379_s2 + $0x60] sm:$0xff]  ;;  %v74_v9 = vld [vmem:[%s379_s2 + $0x58] sm:$0xff]  ;;  %s162_s28 = sshll.u32 %s245_s27, 4  ;;  %s247_s4 = smov 8   ;;  %s163_s28 = int_to_ptr.vmem [resolvable:$true] %s162_s28 }
   0x9   :  { %v15_v8 = vld [vmem:[%s377_s0] sm:$0xff]  ;;  %v73_v10 = vld [vmem:[%s379_s2 + $0x50] sm:$0xff]  ;;  %v16_v11 = vld [vmem:[%s377_s0 + $0x8] sm:$0xff] }
   0xa   :  { %178 = vmatpush.xpose.msk.msra.mxu0 %vm21_vm0, %v18_v4  ;;  %v72_v12 = vld [vmem:[%s379_s2 + $0x48] sm:$0xff]  ;;  %v71_v13 = vld [vmem:[%s379_s2 + $0x40] sm:$0xff]  ;;  %v70_v14 = vld [vmem:[%s379_s2 + $0x38] sm:$0xff] }
   0xb   :  { %184 = vmatpush.xpose.msk.msra.mxu1 %vm21_vm0, %v76_v5  ;;  %202 = vmatpush.xpose.msk.msra.mxu2 %vm21_vm0, %v76_v5  ;;  %v69_v15 = vld [vmem:[%s379_s2 + $0x30] sm:$0xff]  ;;  %v68_v16 = vld [vmem:[%s379_s2 + $0x28] sm:$0xff]  ;;  %v67_v17 = vld [vmem:[%s379_s2 + $0x20] sm:$0xff] }
   0xc   :  { %v66_v18 = vld [vmem:[%s379_s2 + $0x18] sm:$0xff]  ;;  %v65_v19 = vld [vmem:[%s379_s2 + $0x10] sm:$0xff]  ;;  %v64_v20 = vld [vmem:[%s379_s2 + $0x8] sm:$0xff] }
   0xd   :  { %v63_v21 = vld [vmem:[%s379_s2] sm:$0xff]  ;;  %s246_s2 = smov 128  }
   0xe   :  { %179 = vmatpush.xpose.msk.msra.mxu0 %vm21_vm0, %v17_v6 }
   0xf   :  { %185 = vmatpush.xpose.msk.msra.mxu1 %vm21_vm0, %v75_v7  ;;  %203 = vmatpush.xpose.msk.msra.mxu2 %vm21_vm0, %v75_v7 }
  0x11   :  { %180 = vmatmul.msk.f32.vlgmr.msra.gmra.mxu0 %vm21_vm0, %v15_v8 }
  0x13   :  { %186 = vmatpush.xpose.msk.msra.mxu1 %vm21_vm0, %v74_v9  ;;  %204 = vmatpush.xpose.msk.msra.mxu2 %vm21_vm0, %v74_v9 }
  0x17   :  { %187 = vmatpush.xpose.msk.msra.mxu1 %vm21_vm0, %v73_v10  ;;  %205 = vmatpush.xpose.msk.msra.mxu2 %vm21_vm0, %v73_v10 }
  0x19   :  { %181 = vmatmul.msk.f32.gmra.mxu0 %vm21_vm0, %v16_v11 }
  0x1b   :  { %188 = vmatpush.xpose.msk.msra.mxu1 %vm21_vm0, %v72_v12  ;;  %206 = vmatpush.xpose.msk.msra.mxu2 %vm21_vm0, %v72_v12 }
  0x1f   :  { %189 = vmatpush.xpose.msk.msra.mxu1 %vm21_vm0, %v71_v13  ;;  %207 = vmatpush.xpose.msk.msra.mxu2 %vm21_vm0, %v71_v13 }
  0x23   :  { %190 = vmatpush.xpose.msk.msra.mxu1 %vm21_vm0, %v70_v14  ;;  %208 = vmatpush.xpose.msk.msra.mxu2 %vm21_vm0, %v70_v14 }
  0x27   :  { %191 = vmatpush.xpose.msk.msra.mxu1 %vm21_vm0, %v69_v15  ;;  %209 = vmatpush.xpose.msk.msra.mxu2 %vm21_vm0, %v69_v15 }
  0x2b   :  { %192 = vmatpush.xpose.msk.msra.mxu1 %vm21_vm0, %v68_v16  ;;  %210 = vmatpush.xpose.msk.msra.mxu2 %vm21_vm0, %v68_v16 }
  0x2f   :  { %193 = vmatpush.xpose.msk.msra.mxu1 %vm21_vm0, %v67_v17  ;;  %211 = vmatpush.xpose.msk.msra.mxu2 %vm21_vm0, %v67_v17 }
  0x33   :  { %194 = vmatpush.xpose.msk.msra.mxu1 %vm21_vm0, %v66_v18  ;;  %212 = vmatpush.xpose.msk.msra.mxu2 %vm21_vm0, %v66_v18 }
  0x37   :  { %195 = vmatpush.xpose.msk.msra.mxu1 %vm21_vm0, %v65_v19  ;;  %213 = vmatpush.xpose.msk.msra.mxu2 %vm21_vm0, %v65_v19 }
  0x3b   :  { %196 = vmatpush.xpose.msk.msra.mxu1 %vm21_vm0, %v64_v20  ;;  %214 = vmatpush.xpose.msk.msra.mxu2 %vm21_vm0, %v64_v20 }
  0x3f   :  { %197 = vmatpush.xpose.msk.msra.mxu1 %vm21_vm0, %v63_v21  ;;  %215 = vmatpush.xpose.msk.msra.mxu2 %vm21_vm0, %v63_v21 }
  0x8e   :  { %v57_v22 = vpop.f32.mrf.mxu0 }
  0x8f   :  { %198 = vmatmul.msk.f32.vlgmr.msra.gmra.mxu1 %vm21_vm0, %v57_v22 }
  0x96   :  { %v60_v23 = vpop.f32.mrf.mxu0 }
  0x97   :  { %199 = vmatmul.msk.f32.vlgmr.msra.gmra.mxu2 %vm21_vm0, %v60_v23 }
 0x10c   :  { %v150_v24 = vpop.f32.mrf.mxu1 }
 0x10d   :  { %156 = vst [vmem:[#allocation2] sm:$0xff] %v150_v24 }
 0x11a   :  { %v153_v25 = vpop.f32.mrf.mxu2 }
 0x11b   :  { %157 = vst [vmem:[#allocation2 + $0x8] sm:$0xff] %v153_v25 }
 0x11c   :  { %170 = dma.vmem_to_hbm [thread:$0]  %s163_s28, 256, %s165_s30, [#allocation3], %s246_s2, %s246_s2, %s247_s4  }
 0x11d   :  { %243 = dma.done.wait [#allocation3], 256  }
 0x11e   :  { %244 = vsyncadd [#allocation3], 4294967040 }
 0x11f   :  { %175 = vsyncpa [#allocation3], 1 }

</bundles_post_ra>
